<compile_context>
chip_gen: v6e
topology: v6e:2x2x1
jax: 0.10.0
libtpu: 0.0.40
codegen_flags: <defaults>
</compile_context>

<pallas_src>
import math

import jax
import jax.numpy as jnp
from jax.experimental import pallas as pl
from jax.experimental.pallas import tpu as pltpu


# ----------------------------- hardware query --------------------------------

_VMEM_CAP = [None]


def _vmem_capacity_bytes():
    """Physical VMEM of the current generation (64 MiB v7x, 128 MiB v5e/v6e)."""
    if _VMEM_CAP[0] is None:
        try:
            _VMEM_CAP[0] = int(pltpu.get_tpu_info().vmem_capacity_bytes)
        except Exception:
            _VMEM_CAP[0] = 64 << 20          # conservative (v7x-sized) fallback
    return _VMEM_CAP[0]


# ------------------------------ Pallas kernel ---------------------------------

def _make_kernel(w_first: bool, aliased: bool, h_out: int, w_out: int, tile_h: int):
    """Separable bilinear resize on the MXU (bf16 inputs, f32 accumulation) with
    the zero pad fused into zero-extended interpolation matrices and per-channel
    normalization applied as an output-tile epilogue."""
    def kernel(mean_ref, inv_std_ref, img_ref, wh_ref, wwt_ref, *rest):
        out_ref = rest[1] if aliased else rest[0]   # aliased batch buffer is write-through only
        c = pl.program_id(1)
        r = pl.program_id(2)

        x = img_ref[0, 0]                           # (h_in, w_in) bf16
        if w_first:
            t = jnp.dot(x, wwt_ref[...], preferred_element_type=jnp.float32)   # (h_in, w_pad)
            y = jnp.dot(wh_ref[...], t.astype(jnp.bfloat16),
                        preferred_element_type=jnp.float32)                    # (h_pad, w_pad)
        else:
            t = jnp.dot(wh_ref[...], x, preferred_element_type=jnp.float32)    # (tile_h, w_in)
            y = jnp.dot(t.astype(jnp.bfloat16), wwt_ref[...],
                        preferred_element_type=jnp.float32)                    # (tile_h, w_pad)

        # Normalization epilogue (VPU): no per-channel VMEM scratch and no
        # serial r==0 dependency -> every grid axis is independent.
        inv_std = inv_std_ref[c]
        bias = mean_ref[c] * inv_std
        rows = jax.lax.broadcasted_iota(jnp.int32, y.shape, 0) + r * tile_h
        cols = jax.lax.broadcasted_iota(jnp.int32, y.shape, 1)
        valid = (rows < h_out) & (cols < w_out)
        # Zero rows/cols of Wh/Wwt already realize batch_images()'s padding:
        # one full, unmasked, lane-dense store per grid step.
        out_ref[0, 0] = y * inv_std - jnp.where(valid, bias, 0.0)
    return kernel


def _interp_matrix(out_size, in_size):
    """Bilinear interpolation matrix, PyTorch align_corners=False semantics
    (half-pixel centers, negative source coordinates clamped to 0). One-hot /
    iota construction — no scatter-add prologue under jit."""
    i = jnp.arange(out_size, dtype=jnp.float32)
    src = jnp.maximum((i + 0.5) * (float(in_size) / float(out_size)) - 0.5, 0.0)
    x0f = jnp.floor(src)
    lam = (src - x0f)[:, None]
    x0 = x0f.astype(jnp.int32)[:, None]
    x1 = jnp.minimum(x0 + 1, in_size - 1)
    cols = jax.lax.broadcasted_iota(jnp.int32, (out_size, in_size), 1)
    return jnp.where(cols == x0, 1.0 - lam, 0.0) + jnp.where(cols == x1, lam, 0.0)


def _pick_tile_h(h_pad, cap=512):
    """Largest row tile <= cap dividing h_pad; prefer multiples of 128 (full MXU
    M passes on v5e), fall back to multiples of 32 (h_pad % 32 == 0 always)."""
    if h_pad <= cap:
        return h_pad
    best32, best128 = 32, 0
    for t in range(32, cap + 1, 32):
        if h_pad % t == 0:
            best32 = t
            if t % 128 == 0:
                best128 = t
    return best128 if best128 else best32


def _resize_pad_group(batch_buf, batch_shape, img_base, grp, mean, inv_std,
                      h_out, w_out, h_pad, w_pad):
    """Normalize + bilinear resize + zero-pad a group of same-shaped images
    (stacked as (G, C, h_in, w_in) bf16) directly into the (N, C, h_pad, w_pad)
    batch buffer (aliased in place when batch_buf is given)."""
    g_n, c_n, h_in, w_in = grp.shape

    # Zero-extended bf16 interpolation matrices fuse the zero pad into the matmuls.
    wh_p = jnp.pad(_interp_matrix(h_out, h_in),
                   ((0, h_pad - h_out), (0, 0))).astype(jnp.bfloat16)      # (h_pad, h_in)
    wwt_p = jnp.pad(_interp_matrix(w_out, w_in).T,
                    ((0, 0), (0, w_pad - w_out))).astype(jnp.bfloat16)     # (w_in, w_pad)

    tile_h = _pick_tile_h(h_pad)
    n_row_tiles = h_pad // tile_h

    # Matmul-order choice (only when one row tile covers h_pad; with row tiling,
    # Wh-first avoids recomputing the width resize per tile).
    flops_h_first = h_pad * h_in * w_in + h_pad * w_in * w_pad
    flops_w_first = h_in * w_in * w_pad + h_pad * h_in * w_pad
    w_first = (n_row_tiles == 1) and (flops_w_first < flops_h_first)

    aliased = batch_buf is not None
    kernel = _make_kernel(w_first, aliased, h_out, w_out, tile_h)

    in_specs = [
        pl.BlockSpec(memory_space=pltpu.MemorySpace.SMEM),                   # mean  (C,)
        pl.BlockSpec(memory_space=pltpu.MemorySpace.SMEM),                   # 1/std (C,)
        pl.BlockSpec((1, 1, h_in, w_in), lambda g, ci, ri: (g, ci, 0, 0)),   # image channel (bf16)
        pl.BlockSpec((tile_h, h_in), lambda g, ci, ri: (ri, 0)),             # Wh row tile (bf16)
        pl.BlockSpec((w_in, w_pad), lambda g, ci, ri: (0, 0)),               # Wwt (bf16, constant)
    ]
    args = [mean, inv_std, grp, wh_p, wwt_p]
    io_aliases = {}
    if aliased:
        in_specs.append(pl.BlockSpec(memory_space=pl.ANY))                   # batch buffer (aliased)
        args.append(batch_buf)
        io_aliases = {5: 0}

    out_spec = pl.BlockSpec((1, 1, tile_h, w_pad),
                            lambda g, ci, ri: (img_base + g, ci, ri, 0))

    flops = int(2 * g_n * c_n * (flops_w_first if w_first else flops_h_first))
    bytes_accessed = int(2 * g_n * c_n * h_in * w_in + 2 * h_pad * h_in
                         + 2 * w_in * w_pad + 8 * c_n
                         + 4 * g_n * c_n * h_pad * w_pad)

    # Per-step VMEM: double-buffered bf16 input blocks + f32 output block +
    # matmul intermediates; generation-aware cap (~85% of 64 MiB on v7x,
    # ~85% of 128 MiB on v5e/v6e).
    blk_in = 2 * (h_in * w_in + tile_h * h_in + w_in * w_pad)                # bf16
    blk_out = 4 * tile_h * w_pad
    inter = 4 * ((h_in * w_pad) if w_first else (tile_h * w_in)) + 4 * tile_h * w_pad
    vmem_need = 2 * (blk_in + blk_out) + inter
    vmem_limit = int(min(max(2 * vmem_need + (4 << 20), 16 << 20),
                         int(0.85 * _vmem_capacity_bytes())))

    return pl.pallas_call(
        kernel,
        out_shape=jax.ShapeDtypeStruct(tuple(batch_shape), jnp.float32),
        grid_spec=pltpu.PrefetchScalarGridSpec(
            num_scalar_prefetch=0,
            grid=(g_n, c_n, n_row_tiles),
            in_specs=in_specs,
            out_specs=out_spec,
        ),
        input_output_aliases=io_aliases,
        cost_estimate=pl.CostEstimate(flops=flops, transcendentals=0,
                                      bytes_accessed=bytes_accessed),
        compiler_params=pltpu.CompilerParams(
            dimension_semantics=("parallel", "parallel", "parallel"),
            vmem_limit_bytes=vmem_limit,
        ),
    )(*args)


# --------------------------------- JAX glue -----------------------------------

def resize_boxes(boxes, original_size, new_size):
    # Tiny elementwise op, kept as plain-JAX glue (not a hot path).
    ratio_h = float(new_size[0]) / float(original_size[0])
    ratio_w = float(new_size[1]) / float(original_size[1])
    xmin = boxes[:, 0] * ratio_w
    ymin = boxes[:, 1] * ratio_h
    xmax = boxes[:, 2] * ratio_w
    ymax = boxes[:, 3] * ratio_h
    return jnp.stack([xmin, ymin, xmax, ymax], axis=1)


class ImageList:
    def __init__(self, tensors, image_sizes):
        self.tensors = tensors           # (N, C, H_pad, W_pad)
        self.image_sizes = image_sizes   # list of (h, w) after resize


class GeneralizedRCNNTransformKL:
    def __init__(self, min_size, max_size, image_mean, image_std):
        if not isinstance(min_size, (list, tuple)):
            min_size = (min_size,)
        self.min_size = min_size
        self.max_size = max_size
        self.image_mean = jnp.asarray(image_mean, jnp.float32)
        self.image_std = jnp.asarray(image_std, jnp.float32)
        self.inv_std = 1.0 / self.image_std   # multiply, don't divide, in-kernel
        self.training = False
        self.size_divisible = 32

    def _resized_hw(self, h, w):
        size = float(self.min_size[-1])
        min_side = float(min(h, w))
        max_side = float(max(h, w))
        scale = size / min_side
        if max_side * scale > float(self.max_size):
            scale = float(self.max_size) / max_side
        # recompute_scale_factor=True -> output size = floor(in * scale)
        return int(math.floor(h * scale)), int(math.floor(w * scale))

    def postprocess(self, result, image_shapes, original_image_sizes):
        # eval-mode box rescale back to the original image size (plain-JAX glue)
        for i, (pred, im_s, o_im_s) in enumerate(
                zip(result, image_shapes, original_image_sizes)):
            pred['boxes'] = resize_boxes(pred['boxes'], im_s, o_im_s)
        return result

    def __call__(self, images, targets=None):
        resized_hw = [self._resized_hw(img.shape[-2], img.shape[-1]) for img in images]
        stride = float(self.size_divisible)
        h_pad = int(math.ceil(max(h for h, _ in resized_hw) / stride) * stride)
        w_pad = int(math.ceil(max(w for _, w in resized_hw) / stride) * stride)
        batch_shape = (len(images), images[0].shape[0], h_pad, w_pad)

        # Group consecutive images that share a raw shape (hence resized shape):
        # one pallas_call per group with a leading image grid axis.
        groups = []
        i = 0
        while i < len(images):
            j = i
            while j + 1 < len(images) and images[j + 1].shape == images[i].shape:
                j += 1
            groups.append((i, j - i + 1, tuple(images[i].shape), resized_hw[i]))
            i = j + 1

        def batch_fn(mean, inv_std, *imgs):
            buf = None   # first group creates the batch buffer, later groups alias into it
            for (start, count, (_, h_in, w_in), (h_out, w_out)) in groups:
                grp = jnp.stack(imgs[start:start + count]).astype(jnp.bfloat16)
                buf = _resize_pad_group(buf, batch_shape, start, grp, mean, inv_std,
                                        h_out, w_out, h_pad, w_pad)
            return buf

        batched = jax.jit(batch_fn)(self.image_mean, self.inv_std, *images)

        if targets is not None:
            new_targets = []
            for img, (h_out, w_out), t in zip(images, resized_hw, targets):
                t = dict(t)
                t['boxes'] = resize_boxes(t['boxes'],
                                          (img.shape[-2], img.shape[-1]),
                                          (h_out, w_out))
                new_targets.append(t)
            targets = new_targets

        return ImageList(batched, [(h, w) for h, w in resized_hw]), targets


def _reference(img, mean, std, h_out, w_out, h_pad, w_pad):
    """Pure-JAX f32 reference for normalize + bilinear resize + zero pad."""
    wh = _interp_matrix(h_out, img.shape[1])
    wwt = _interp_matrix(w_out, img.shape[2]).T
    x = (img - mean[:, None, None]) / std[:, None, None]
    y = jnp.einsum('oh,chw,wn->con', wh, x, wwt,
                   precision=jax.lax.Precision.HIGHEST)
    out = jnp.zeros((img.shape[0], h_pad, w_pad), jnp.float32)
    return out.at[:, :h_out, :w_out].set(y)


# ----------------------------------- main --------------------------------------

if __name__ == "__main__":
    key = jax.random.PRNGKey(0)
    k1, k2, k3, k4 = jax.random.split(key, 4)

    # Three images: img1/img2 share a shape (exercises the grouped image grid
    # axis + aliased write-back); img0 differs (exercises resize + both matmul
    # orders + batch padding).
    img0 = jax.random.uniform(k1, (3, 16, 16), dtype=jnp.float32)
    img1 = jax.random.uniform(k2, (3, 14, 20), dtype=jnp.float32)
    img2 = jax.random.uniform(k3, (3, 14, 20), dtype=jnp.float32)
    boxes = [jax.random.uniform(k4, (4, 4), dtype=jnp.float32) * 12.0 for _ in range(3)]
    targets = [{'boxes': b} for b in boxes]

    transform = GeneralizedRCNNTransformKL(
        min_size=24, max_size=48,
        image_mean=[0.485, 0.456, 0.406],
        image_std=[0.229, 0.224, 0.225])

    image_list, out_targets = transform([img0, img1, img2], targets)
    batched = jax.block_until_ready(image_list.tensors)

    assert batched.shape == (3, 3, 32, 64), batched.shape
    assert image_list.image_sizes == [(24, 24), (24, 34), (24, 34)], image_list.image_sizes

    # sanity: compare Pallas result against a plain-JAX f32 reference.
    # bf16 MXU inputs with f32 accumulation: expected error ~ (few bf16 ulps) *
    # normalized magnitude (<= ~2.7), comfortably under the 5e-2 bound.
    for i, (img, (h, w)) in enumerate(zip([img0, img1, img2], image_list.image_sizes)):
        ref = _reference(img, transform.image_mean, transform.image_std,
                         h, w, batched.shape[-2], batched.shape[-1])
        err_max = float(jnp.max(jnp.abs(batched[i] - ref)))
        err_mean = float(jnp.mean(jnp.abs(batched[i] - ref)))
        assert err_max < 5e-2 and err_mean < 1e-2, \
            f"mismatch on image {i}: max {err_max}, mean {err_mean}"

    print("KERNEL_OK")
</pallas_src>

<mosaic_0001>
module attributes {stable_mosaic.version = 11 : i64} {
  func.func @kernel(%arg0: i32, %arg1: i32, %arg2: i32, %arg3: memref<3xf32, #tpu.memory_space<smem>>, %arg4: memref<3xf32, #tpu.memory_space<smem>>, %arg5: memref<1x1x16x16xbf16, #tpu.memory_space<vmem>>, %arg6: memref<32x16xbf16, #tpu.memory_space<vmem>>, %arg7: memref<16x64xbf16, #tpu.memory_space<vmem>>, %arg8: memref<1x1x32x64xf32, #tpu.memory_space<vmem>>) attributes {dimension_semantics = [#tpu.dimension_semantics<parallel>, #tpu.dimension_semantics<parallel>, #tpu.dimension_semantics<parallel>], iteration_bounds = array<i64: 1, 3, 1>, scalar_prefetch = 0 : i64, scratch_operands = 0 : i64, tpu.core_type = #tpu.core_type<tc>, window_params = [{transform_indices = @transform_0, window_bounds = array<i64: 3>}, {transform_indices = @transform_1, window_bounds = array<i64: 3>}, {transform_indices = @transform_2, window_bounds = array<i64: 1, 1, 16, 16>}, {transform_indices = @transform_3, window_bounds = array<i64: 32, 16>}, {pipeline_mode = #tpu.pipeline_mode<synchronous>, transform_indices = @transform_4, window_bounds = array<i64: 16, 64>}, {transform_indices = @transform_5, window_bounds = array<i64: 1, 1, 32, 64>}]} {
    %c0 = arith.constant 0 : index
    %c0_0 = arith.constant 0 : index
    %c0_1 = arith.constant 0 : index
    %c0_2 = arith.constant 0 : index
    %0 = vector.load %arg5[%c0, %c0_0, %c0_1, %c0_2] : memref<1x1x16x16xbf16, #tpu.memory_space<vmem>>, vector<1x1x16x16xbf16>
    %1 = vector.shape_cast %0 : vector<1x1x16x16xbf16> to vector<16x16xbf16>
    %c0_3 = arith.constant 0 : index
    %c0_4 = arith.constant 0 : index
    %2 = vector.load %arg6[%c0_3, %c0_4] : memref<32x16xbf16, #tpu.memory_space<vmem>>, vector<32x16xbf16>
    %cst = arith.constant dense<0.000000e+00> : vector<32x16xf32>
    %3 = tpu.matmul %2, %1, %cst {dimension_numbers = #tpu.dot_dimension_numbers<[1], [0], [0], [1], [0, 0, 1, 1], [], []>} : vector<32x16xbf16>, vector<16x16xbf16>, vector<32x16xf32> -> vector<32x16xf32>
    %4 = arith.truncf %3 : vector<32x16xf32> to vector<32x16xbf16>
    %c0_5 = arith.constant 0 : index
    %c0_6 = arith.constant 0 : index
    %5 = vector.load %arg7[%c0_5, %c0_6] : memref<16x64xbf16, #tpu.memory_space<vmem>>, vector<16x64xbf16>
    %cst_7 = arith.constant dense<0.000000e+00> : vector<32x64xf32>
    %6 = tpu.matmul %4, %5, %cst_7 {dimension_numbers = #tpu.dot_dimension_numbers<[1], [0], [0], [1], [0, 0, 1, 1], [], []>} : vector<32x16xbf16>, vector<16x64xbf16>, vector<32x64xf32> -> vector<32x64xf32>
    %7 = arith.index_cast %arg1 : i32 to index
    %8 = memref.load %arg4[%7] : memref<3xf32, #tpu.memory_space<smem>>
    %9 = arith.index_cast %arg1 : i32 to index
    %10 = memref.load %arg3[%9] : memref<3xf32, #tpu.memory_space<smem>>
    %11 = arith.mulf %10, %8 : f32
    %12 = tpu.iota {dimensions = array<i32: 0>} : vector<32x64xi32>
    %c32_i32 = arith.constant 32 : i32
    %13 = arith.muli %arg2, %c32_i32 : i32
    %14 = vector.broadcast %13 : i32 to vector<32x64xi32>
    %15 = arith.addi %12, %14 : vector<32x64xi32>
    %16 = tpu.iota {dimensions = array<i32: 1>} : vector<32x64xi32>
    %c24_i32 = arith.constant 24 : i32
    %17 = vector.broadcast %c24_i32 : i32 to vector<32x64xi32>
    %18 = arith.cmpi slt, %15, %17 : vector<32x64xi32>
    %c24_i32_8 = arith.constant 24 : i32
    %19 = vector.broadcast %c24_i32_8 : i32 to vector<32x64xi32>
    %20 = arith.cmpi slt, %16, %19 : vector<32x64xi32>
    %21 = arith.andi %18, %20 : vector<32x64xi1>
    %22 = vector.broadcast %8 : f32 to vector<32x64xf32>
    %23 = arith.mulf %6, %22 : vector<32x64xf32>
    %cst_9 = arith.constant 0.000000e+00 : f32
    %24 = vector.broadcast %11 : f32 to vector<32x64xf32>
    %25 = vector.broadcast %cst_9 : f32 to vector<32x64xf32>
    %26 = arith.select %21, %24, %25 : vector<32x64xi1>, vector<32x64xf32>
    %27 = arith.subf %23, %26 : vector<32x64xf32>
    %c0_10 = arith.constant 0 : index
    %c0_11 = arith.constant 0 : index
    %c0_12 = arith.constant 0 : index
    %c0_13 = arith.constant 0 : index
    %28 = vector.load %arg8[%c0_10, %c0_11, %c0_12, %c0_13] : memref<1x1x32x64xf32, #tpu.memory_space<vmem>>, vector<1x1x32x64xf32>
    %29 = vector.shape_cast %28 : vector<1x1x32x64xf32> to vector<32x64xf32>
    %30 = vector.shape_cast %27 : vector<32x64xf32> to vector<1x1x32x64xf32>
    tpu.vector_store %arg8[%c0_10, %c0_11, %c0_12, %c0_13], %30 {strides = array<i32>} : memref<1x1x32x64xf32, #tpu.memory_space<vmem>>, vector<1x1x32x64xf32>,
    return
  }
  func.func @transform_0(%arg0: i32, %arg1: i32, %arg2: i32) -> i32 {
    %c0_i32 = arith.constant 0 : i32
    %c0_i32_0 = arith.constant 0 : i32
    return %c0_i32 : i32
  }
  func.func @transform_1(%arg0: i32, %arg1: i32, %arg2: i32) -> i32 {
    %c0_i32 = arith.constant 0 : i32
    %c0_i32_0 = arith.constant 0 : i32
    return %c0_i32 : i32
  }
  func.func @transform_2(%arg0: i32, %arg1: i32, %arg2: i32) -> (i32, i32, i32, i32) {
    %c0_i32 = arith.constant 0 : i32
    %c0_i32_0 = arith.constant 0 : i32
    %c0_i32_1 = arith.constant 0 : i32
    return %arg0, %arg1, %c0_i32, %c0_i32_0 : i32, i32, i32, i32
  }
  func.func @transform_3(%arg0: i32, %arg1: i32, %arg2: i32) -> (i32, i32) {
    %c0_i32 = arith.constant 0 : i32
    %c0_i32_0 = arith.constant 0 : i32
    return %arg2, %c0_i32 : i32, i32
  }
  func.func @transform_4(%arg0: i32, %arg1: i32, %arg2: i32) -> (i32, i32) {
    %c0_i32 = arith.constant 0 : i32
    %c0_i32_0 = arith.constant 0 : i32
    %c0_i32_1 = arith.constant 0 : i32
    return %c0_i32, %c0_i32_0 : i32, i32
  }
  func.func @transform_5(%arg0: i32, %arg1: i32, %arg2: i32) -> (i32, i32, i32, i32) {
    %c0_i32 = arith.constant 0 : i32
    %0 = arith.addi %c0_i32, %arg0 : i32
    %c0_i32_0 = arith.constant 0 : i32
    %c0_i32_1 = arith.constant 0 : i32
    return %0, %arg1, %arg2, %c0_i32_0 : i32, i32, i32, i32
  }
}

module attributes {stable_mosaic.version = 11 : i64} {
  func.func @kernel(%arg0: i32, %arg1: i32, %arg2: i32, %arg3: memref<3xf32, #tpu.memory_space<smem>>, %arg4: memref<3xf32, #tpu.memory_space<smem>>, %arg5: memref<1x1x14x20xbf16, #tpu.memory_space<vmem>>, %arg6: memref<32x14xbf16, #tpu.memory_space<vmem>>, %arg7: memref<20x64xbf16, #tpu.memory_space<vmem>>, %arg8: memref<3x3x32x64xf32, #tpu.memory_space<any>>, %arg9: memref<1x1x32x64xf32, #tpu.memory_space<vmem>>) attributes {dimension_semantics = [#tpu.dimension_semantics<parallel>, #tpu.dimension_semantics<parallel>, #tpu.dimension_semantics<parallel>], iteration_bounds = array<i64: 2, 3, 1>, scalar_prefetch = 0 : i64, scratch_operands = 0 : i64, tpu.core_type = #tpu.core_type<tc>, window_params = [{transform_indices = @transform_0, window_bounds = array<i64: 3>}, {transform_indices = @transform_1, window_bounds = array<i64: 3>}, {transform_indices = @transform_2, window_bounds = array<i64: 1, 1, 14, 20>}, {transform_indices = @transform_3, window_bounds = array<i64: 32, 14>}, {pipeline_mode = #tpu.pipeline_mode<synchronous>, transform_indices = @transform_4, window_bounds = array<i64: 20, 64>}, {}, {transform_indices = @transform_6, window_bounds = array<i64: 1, 1, 32, 64>}]} {
    %c0 = arith.constant 0 : index
    %c0_0 = arith.constant 0 : index
    %c0_1 = arith.constant 0 : index
    %c0_2 = arith.constant 0 : index
    %0 = vector.load %arg5[%c0, %c0_0, %c0_1, %c0_2] : memref<1x1x14x20xbf16, #tpu.memory_space<vmem>>, vector<1x1x14x20xbf16>
    %1 = vector.shape_cast %0 : vector<1x1x14x20xbf16> to vector<14x20xbf16>
    %c0_3 = arith.constant 0 : index
    %c0_4 = arith.constant 0 : index
    %2 = vector.load %arg7[%c0_3, %c0_4] : memref<20x64xbf16, #tpu.memory_space<vmem>>, vector<20x64xbf16>
    %cst = arith.constant dense<0.000000e+00> : vector<14x64xf32>
    %3 = tpu.matmul %1, %2, %cst {dimension_numbers = #tpu.dot_dimension_numbers<[1], [0], [0], [1], [0, 0, 1, 1], [], []>} : vector<14x20xbf16>, vector<20x64xbf16>, vector<14x64xf32> -> vector<14x64xf32>
    %c0_5 = arith.constant 0 : index
    %c0_6 = arith.constant 0 : index
    %4 = vector.load %arg6[%c0_5, %c0_6] : memref<32x14xbf16, #tpu.memory_space<vmem>>, vector<32x14xbf16>
    %5 = arith.truncf %3 : vector<14x64xf32> to vector<14x64xbf16>
    %cst_7 = arith.constant dense<0.000000e+00> : vector<32x64xf32>
    %6 = tpu.matmul %4, %5, %cst_7 {dimension_numbers = #tpu.dot_dimension_numbers<[1], [0], [0], [1], [0, 0, 1, 1], [], []>} : vector<32x14xbf16>, vector<14x64xbf16>, vector<32x64xf32> -> vector<32x64xf32>
    %7 = arith.index_cast %arg1 : i32 to index
    %8 = memref.load %arg4[%7] : memref<3xf32, #tpu.memory_space<smem>>
    %9 = arith.index_cast %arg1 : i32 to index
    %10 = memref.load %arg3[%9] : memref<3xf32, #tpu.memory_space<smem>>
    %11 = arith.mulf %10, %8 : f32
    %12 = tpu.iota {dimensions = array<i32: 0>} : vector<32x64xi32>
    %c32_i32 = arith.constant 32 : i32
    %13 = arith.muli %arg2, %c32_i32 : i32
    %14 = vector.broadcast %13 : i32 to vector<32x64xi32>
    %15 = arith.addi %12, %14 : vector<32x64xi32>
    %16 = tpu.iota {dimensions = array<i32: 1>} : vector<32x64xi32>
    %c24_i32 = arith.constant 24 : i32
    %17 = vector.broadcast %c24_i32 : i32 to vector<32x64xi32>
    %18 = arith.cmpi slt, %15, %17 : vector<32x64xi32>
    %c34_i32 = arith.constant 34 : i32
    %19 = vector.broadcast %c34_i32 : i32 to vector<32x64xi32>
    %20 = arith.cmpi slt, %16, %19 : vector<32x64xi32>
    %21 = arith.andi %18, %20 : vector<32x64xi1>
    %22 = vector.broadcast %8 : f32 to vector<32x64xf32>
    %23 = arith.mulf %6, %22 : vector<32x64xf32>
    %cst_8 = arith.constant 0.000000e+00 : f32
    %24 = vector.broadcast %11 : f32 to vector<32x64xf32>
    %25 = vector.broadcast %cst_8 : f32 to vector<32x64xf32>
    %26 = arith.select %21, %24, %25 : vector<32x64xi1>, vector<32x64xf32>
    %27 = arith.subf %23, %26 : vector<32x64xf32>
    %c0_9 = arith.constant 0 : index
    %c0_10 = arith.constant 0 : index
    %c0_11 = arith.constant 0 : index
    %c0_12 = arith.constant 0 : index
    %28 = vector.load %arg9[%c0_9, %c0_10, %c0_11, %c0_12] : memref<1x1x32x64xf32, #tpu.memory_space<vmem>>, vector<1x1x32x64xf32>
    %29 = vector.shape_cast %28 : vector<1x1x32x64xf32> to vector<32x64xf32>
    %30 = vector.shape_cast %27 : vector<32x64xf32> to vector<1x1x32x64xf32>
    tpu.vector_store %arg9[%c0_9, %c0_10, %c0_11, %c0_12], %30 {strides = array<i32>} : memref<1x1x32x64xf32, #tpu.memory_space<vmem>>, vector<1x1x32x64xf32>,
    return
  }
  func.func @transform_0(%arg0: i32, %arg1: i32, %arg2: i32) -> i32 {
    %c0_i32 = arith.constant 0 : i32
    %c0_i32_0 = arith.constant 0 : i32
    return %c0_i32 : i32
  }
  func.func @transform_1(%arg0: i32, %arg1: i32, %arg2: i32) -> i32 {
    %c0_i32 = arith.constant 0 : i32
    %c0_i32_0 = arith.constant 0 : i32
    return %c0_i32 : i32
  }
  func.func @transform_2(%arg0: i32, %arg1: i32, %arg2: i32) -> (i32, i32, i32, i32) {
    %c0_i32 = arith.constant 0 : i32
    %c0_i32_0 = arith.constant 0 : i32
    %c0_i32_1 = arith.constant 0 : i32
    return %arg0, %arg1, %c0_i32, %c0_i32_0 : i32, i32, i32, i32
  }
  func.func @transform_3(%arg0: i32, %arg1: i32, %arg2: i32) -> (i32, i32) {
    %c0_i32 = arith.constant 0 : i32
    %c0_i32_0 = arith.constant 0 : i32
    return %arg2, %c0_i32 : i32, i32
  }
  func.func @transform_4(%arg0: i32, %arg1: i32, %arg2: i32) -> (i32, i32) {
    %c0_i32 = arith.constant 0 : i32
    %c0_i32_0 = arith.constant 0 : i32
    %c0_i32_1 = arith.constant 0 : i32
    return %c0_i32, %c0_i32_0 : i32, i32
  }
  func.func @transform_6(%arg0: i32, %arg1: i32, %arg2: i32) -> (i32, i32, i32, i32) {
    %c1_i32 = arith.constant 1 : i32
    %0 = arith.addi %c1_i32, %arg0 : i32
    %c0_i32 = arith.constant 0 : i32
    %c0_i32_0 = arith.constant 0 : i32
    return %0, %arg1, %arg2, %c0_i32 : i32, i32, i32, i32
  }
}

</mosaic_0001>

<bundles_post_ra>
// kernel: batch_fn.2
= control target key start
LH: loop header
LB: loop body
LE: loop exit
PB: predicated region body
PF: predicated region fallthrough
CT: control target
= control target key end

     0   :  { %10 = vsyncpa [#allocation4], 0  ;;  %s1090_s0 = inlined_call_operand.vmem [shape: f32[3], index: 0, kind: input, shape index: {}]   ;;  %s1091_s1 = inlined_call_operand.vmem [shape: f32[3], index: 1, kind: input, shape index: {}]   ;;  %s1092_s2 = inlined_call_operand.vmem [shape: bf16[1,3,16,16], index: 2, kind: input, shape index: {}]   ;;  %s1093_s3 = inlined_call_operand.vmem [shape: bf16[32,16], index: 3, kind: input, shape index: {}]   ;;  %s1094_s4 = inlined_call_operand.vmem [shape: bf16[16,64], index: 4, kind: input, shape index: {}]   ;;  %s1095_s5 = inlined_call_operand.hbm [shape: f32[3,3,32,64], index: 5, kind: output, shape index: {}]  }
   0x1   :  { %11 = vsyncpa [#allocation6], 0 }
   0x2   :  { %12 = vsyncpa [#allocation3], 0 }
   0x3   :  { %14 = vsyncpa [#allocation3 + $0x1], 0  ;;  %s919_s18 = smov 0   ;;  %s921_s19 = smov 0  }
   0x4   :  { %s923_s20 = smov 0   ;;  %s925_s21 = smov 0  }
   0x5   :  { %s927_s22 = smov 0   ;;  %s929_s23 = smov 0  }
   0x6 LB: > { %s640_s24 = sadd.s32 4294967295, %s882_s23   ;;  %s641_s25 = sadd.s32 4294967294, %s882_s23   ;;  %s882_s23 = sphi %s929_s23, %s20_s23   ;;  %s878_s22 = sphi %s927_s22, %s1113_s22   ;;  %s874_s21 = sphi %s925_s21, %s1112_s21   ;;  %s870_s20 = sphi %s923_s20, %s1111_s20   ;;  %s866_s19 = sphi %s921_s19, %s1110_s19   ;;  %s862_s18 = sphi %s919_s18, %s1109_s18  }
   0x7   : > { %s35_s26 = sadd.s32 1, %s878_s22  ;;  %s167_s27 = sadd.s32 1, %s870_s20 }
   0x8   : > { %p37_p0 = scmp.ge.s32.totalorder %s35_s26, 3  ;;  %p177_p1 = scmp.ne.s32.totalorder %s870_s20, %s866_s19 }
   0x9   : > { %p178_p2 = scmp.eq.s32.totalorder %s640_s24, 2  ;;  %p183_p3 = scmp.ne.s32.totalorder %s866_s19, %s862_s18 }
   0xa   : > { %s1115_s26 = smov (%p37_p0, %s35_s26), 0  ;;  %p184_p5 = scmp.eq.s32.totalorder %s641_s25, 2 }
   0xb   : > { %p959_p4 = por %p178_p2, %p177_p1  ;;  %s161_s29 = ssub.s32 %s878_s22, %s1115_s26 }
   0xc   : > { %p642_p6 = scmp.ge.s32.totalorder %s882_s23, 1  ;;  %p165_p7 = scmp.eq.s32.totalorder %s161_s29, 0 }
   0xd   : > { %s1100_s28 = scalar_select %p959_p4, 1, 0 }
   0xe   : > { %p966_p8 = por %p184_p5, %p183_p3  ;;  %p191_p9 = scmp.lt.s32.totalorder %s882_s23, 4 }
   0xf   : > { %s972_s6 = scalar_select %p165_p7, %s870_s20, %s167_s27  }
  0x10   : > { %s1101_s30 = scalar_select %p966_p8, 1, 0 }
  0x11   : > { %p974_p10 = pnand %p642_p6, %p191_p9  ;;  %p978_p11 = scmp.eq.s32.totalorder %s640_s24, 0 }
  0x12   : > { %s204_s11 = sshll.u32 %s1090_s0, 4  ;;  %s215_s14 = sshll.u32 %s1091_s1, 4  ;;  %s205_s11 = int_to_ptr.vmem [resolvable:$true] %s204_s11  ;;  %s216_s14 = int_to_ptr.vmem [resolvable:$true] %s215_s14 }
  0x13   : > { %s1102_s7 = scalar_select %p974_p10, 1, 0 }
  0x14   : > { %s1103_s8 = scalar_select %p978_p11, 1, 0 }
  0x15   : > { %p696_p12 = pneg %p974_p10  ;;  %s768_s16 = scalar_lea.vmem %s205_s11, 16 }
  0x16   : > { %p769_p0 = scmp.ne.s32.totalorder %s205_s11, %s768_s16  ;;  %p776_p5 = scmp.lt.s32.totalorder %s205_s11, %s205_s11 }
  0x17   : > { %p992_p13 = pnand %p978_p11, %p696_p12  ;;  %p777_p6 = scmp.lt.s32.totalorder %s768_s16, %s768_s16 }
  0x19   : > { %p770_p1 = pneg %p992_p13  ;;  %p778_p7 = por %p777_p6, %p776_p5 }
  0x1b   : > { %p771_p2 = pnand %p770_p1, %p769_p0 }
  0x1d   : > { %p772_p3 = pneg %p771_p2 }
  0x1f   : > { %p779_p9 = pnand %p778_p7, %p772_p3 }
  0x21   : > { %782 = shalt.err (!%p779_p9)
}
  0x22   : > { %s884_s17 = smov [#allocation2]   ;;  %s783_s24 = scalar_lea.vmem %s216_s14, 16 }
  0x23   : > { %699 = dma.vmem_to_smem (!%p992_p13), %s205_s11, 16, %s884_s17, [#allocation4]  }
  0x24   : > { %p784_p12 = scmp.ne.s32.totalorder %s216_s14, %s783_s24  ;;  %p791_p11 = scmp.lt.s32.totalorder %s216_s14, %s216_s14 }
  0x25   : > { %p792_p10 = scmp.lt.s32.totalorder %s783_s24, %s783_s24 }
  0x26   : > { %p786_p8 = pnand %p784_p12, %p770_p1 }
  0x27   : > { %p793_p0 = por %p792_p10, %p791_p11 }
  0x28   : > { %p787_p4 = pneg %p786_p8 }
  0x2a   : > { %p794_p2 = pnand %p793_p0, %p787_p4 }
  0x2c   : > { %797 = shalt.err (!%p794_p2)
}
  0x2d   : > { %s885_s25 = smov [#allocation5]   ;;  %p1105_p3 = scmp.ne.s32.totalorder %s1102_s7, 0 }
  0x2e   : > { %702 = dma.vmem_to_smem (!%p992_p13), %s216_s14, 16, %s885_s25, [#allocation6]  }
  0x2f   : > { %252 = sbr.rel (%p1105_p3) target bundleno = 487 (0x1e7), region = 40  ;;  %p1106_p5 = scmp.ne.s32.totalorder (!%p1105_p3), %s1103_s8, 0 }
  0x34   : > { %849 = dma.done.wait (%p1106_p5), [#allocation4], 16  }
  0x35   : > { %851 = vsyncadd (%p1106_p5), [#allocation4], 4294967280 }
  0x36   : > { %853 = dma.done.wait (%p1106_p5), [#allocation6], 16  }
  0x37   : > { %855 = vsyncadd (%p1106_p5), [#allocation6], 4294967280 }
  0x38   : > { %262 = sfence }
  0x39   : > { %p296_p4 = scmp.lt.s32.totalorder %s874_s21, 2  ;;  %v765_v0 = vld [vmem:[%s1093_s3] sm:$0xff]   ;;  %vm333_vm0 = vcmask 130048   ;;  %v766_v2 = vld [vmem:[%s1093_s3 + $0x8] sm:$0xff]   ;;  %s454_s16 = sld [smem:[#allocation5 + %s874_s21]]  ;;  %v468_v10 = vlaneseq  ;;  %vm493_vm2 = vcmask 523264  }
  0x3a   : > { %676 = vmatprep.mubr.msk.bf16.mxu0 %vm333_vm0, %v765_v0  ;;  %v767_v3 = vld [vmem:[%s1094_s4] sm:$0xff]   ;;  %s455_s17 = sld [smem:[#allocation2 + %s874_s21]]  ;;  %s291_s25 = sand.u32 1, %s866_s19  }
  0x3b   : > { %s297_s7 = scalar_select %p296_p4, %s874_s21, 2  ;;  %680 = vmatprep.subr.bf16.mxu1 %v767_v3  ;;  %v469_v11 = vand.u32 127, %v468_v10 }
  0x3c   : > { %681 = vmatpush3.bf16.msra.mxu1 %v767_v3  ;;  %s650_s27 = sshll.u32 %s291_s25, 5  ;;  %p1107_p10 = scmp.ne.s32.totalorder %s1100_s28, 0 }
  0x3d   : > { %s666_s9 = sshll.u32 %s297_s7, 3  ;;  %vm474_vm1 = vcmp.lt.s32.totalorder %v469_v11, 24  ;;  %s293_s29 = scalar_lea.vmem [#allocation7], %s650_s27 }
  0x3e   : > { %s302_s12 = scalar_lea.vmem %s1092_s2, %s666_s9  ;;  %s516_s7 = sshll.u32 %s293_s29, 4  ;;  %s1042_s7 = int_to_ptr.vmem [resolvable:$true] %s516_s7 }
  0x3f   : > { %v764_v1 = vld [vmem:[%s302_s12] sm:$0xff]   ;;  %v479_v13 = vstv %s454_s16  ;;  %s667_s9 = sshll.u32 %s874_s21, 9  ;;  %s1045_s21 = scalar_lea.sflag [#allocation3], %s291_s25 }
  0x40   : > { %674 = vmatprep.subr.bf16.mxu0 %v764_v1  ;;  %s456_s24 = smul.f32 %s455_s17, %s454_s16  ;;  %s1040_s12 = scalar_lea.hbm %s1095_s5, %s667_s9 }
  0x41   : > { %675 = vmatpush3.bf16.msra.mxu0 %v764_v1  ;;  %s798_s8 = scalar_lea.vmem %s1042_s7, 512  ;;  %s886_s13 = smov [#allocation7]  }
  0x42   : > { %v484_v12 = vstv %s456_s24  ;;  %p799_p8 = scmp.ne.s32.totalorder %s1042_s7, %s798_s8  ;;  %s802_s14 = sshll.u32 %s886_s13, 4  ;;  %s803_s14 = int_to_ptr.vmem [resolvable:$false] %s802_s14 }
  0x43   : > { %v485_v15 = vsel %vm474_vm1, %v484_v12, 0.0  ;;  %s804_s15 = scalar_lea.vmem %s803_s14, 1024  ;;  %p805_p1 = scmp.lt.s32.totalorder %s1042_s7, %s803_s14 }
  0x44   : > { %677 = vmatmul.mubr.msk.bf16.vlgmr.msra.gmra.mxu0 %vm333_vm0, %v766_v2  ;;  %p800_p11 = pnand %p799_p8, %p1107_p10  ;;  %p806_p6 = scmp.lt.s32.totalorder %s804_s15, %s798_s8 }
  0x46   : > { %p801_p13 = pneg %p800_p11  ;;  %p807_p7 = por %p806_p6, %p805_p1 }
  0x48   : > { %p808_p9 = pnand %p807_p7, %p801_p13 }
 0x104   : > { %v678_v4 = vpop.f32.mrf.mxu0 }
 0x106   : > { %v374_v5 = vpop.f32.mrf.mxu0 }
 0x108   : > { %v679_v6 = vpop.f32.mrf.mxu0 }
 0x109   : > { %v390_v9 = vpack.c.bf16 %v679_v6, %v678_v4 }
 0x10a   : > { %v377_v7 = vpop.f32.mrf.mxu0 }
 0x10b   : > { %v389_v8 = vpack.c.bf16 %v377_v7, %v374_v5 }
 0x10d   : > { %682 = vmatprep.mubr.msk.bf16.mxu1 %vm333_vm0, %v389_v8 }
 0x10e   : > { %683 = vmatmul.mubr.msk.bf16.vlgmr.msra.gmra.mxu1 %vm333_vm0, %v390_v9 }
 0x1ce   : > { %v684_v14 = vpop.f32.mrf.mxu1 }
 0x1cf   : > { %v482_v16 = vmul.f32 %v684_v14, %v479_v13 }
 0x1d0   : > { %v439_v17 = vpop.f32.mrf.mxu1 }
 0x1d1   : > { %v491_v18 = vsub.f32 %v482_v16, %v485_v15  ;;  %v480_v19 = vmul.f32 %v479_v13, %v439_v17 }
 0x1d2   : > { %v685_v20 = vpop.f32.mrf.mxu1 }
 0x1d3   : > { %496 = vst.msk [vmem:[%s293_s29 + $0x10] sm:$0xff] %vm493_vm2, %v491_v18  ;;  %v489_v21 = vsub.f32 %v480_v19, %v485_v15  ;;  %v483_v22 = vmul.f32 %v685_v20, %v479_v13 }
 0x1d4   : > { %v442_v23 = vpop.f32.mrf.mxu1 }
 0x1d5   : > { %494 = vst.msk [vmem:[%s293_s29] sm:$0xff] %vm493_vm2, %v489_v21  ;;  %497 = vst.msk [vmem:[%s293_s29 + $0x18] sm:$0xff] %vm493_vm2, %v483_v22  ;;  %v481_v24 = vmul.f32 %v479_v13, %v442_v23 }
 0x1d7   : > { %v490_v25 = vsub.f32 %v481_v24, %v485_v15 }
 0x1d9   : > { %495 = vst.msk [vmem:[%s293_s29 + $0x8] sm:$0xff] %vm493_vm2, %v490_v25 }
 0x1da   : > { %811 = shalt.err (!%p808_p9)
}
 0x1db   : > { %s812_s16 = scalar_lea.hbm %s1040_s12, 512  ;;  %s816_s25 = scalar_lea.hbm %s1095_s5, 4608 }
 0x1dc   : > { %p813_p12 = scmp.ne.s32.totalorder %s1040_s12, %s812_s16  ;;  %p817_p3 = scmp.lt.s32.totalorder %s1040_s12, %s1095_s5 }
 0x1dd   : > { %p818_p5 = scmp.lt.s32.totalorder %s816_s25, %s812_s16 }
 0x1de   : > { %p814_p0 = pnand %p813_p12, %p1107_p10 }
 0x1df   : > { %p819_p4 = por %p818_p5, %p817_p3 }
 0x1e0   : > { %p815_p2 = pneg %p814_p0 }
 0x1e2   : > { %p820_p8 = pnand %p819_p4, %p815_p2 }
 0x1e4   : > { %823 = shalt.err (!%p820_p8)
}
 0x1e5   : > { %s887_s9 = smov 128   ;;  %s888_s10 = smov 8  }
 0x1e6   : > { %694 = dma.vmem_to_hbm [thread:$0]  (%p1107_p10), %s1042_s7, 512, %s1040_s12, %s1045_s21, %s887_s9, %s887_s9, %s888_s10  }
 0x1e7 PF: > { %p711_p11 = scmp.ge.s32.totalorder %s882_s23, 2  ;;  %s531_s11 = sand.u32 1, %s862_s18  }
 0x1e8   : > { %p1108_p13 = scmp.ne.s32.totalorder %s1101_s30, 0  ;;  %s532_s8 = scalar_lea.sflag [#allocation3], %s531_s11 }
 0x1ea   : > { %p704_p1 = pnand %p711_p11, %p1108_p13 }
 0x1ec   : > { %p705_p6 = pneg %p704_p1 }
 0x1ee   : > { %857 = dma.done.wait (%p705_p6), %s532_s8, 512  }
 0x1ef   : > { %859 = vsyncadd (%p705_p6), %s532_s8, 4294966784  ;;  %s20_s23 = sadd.s32 1, %s882_s23   ;;  %s1109_s18 = smov %s866_s19 }
 0x1f0   : > { %p17_p7 = scmp.ge.s32.totalorder %s20_s23, 5   ;;  %s1110_s19 = smov %s870_s20 }
 0x1f1   : > { %s1111_s20 = smov %s972_s6  ;;  %s1112_s21 = smov %s878_s22 }
 0x1f2   : > { %s1113_s22 = smov %s1115_s26  ;;  %19 = sbr.rel (!%p17_p7) target bundleno = 6 (0x6), region = 87 }
 0x1f7   :  { %537 = vsyncpa [#allocation3], 1 }
 0x1f8   :  { %539 = vsyncpa [#allocation3 + $0x1], 1 }
 0x1f9   :  { %540 = vsyncpa [#allocation4], 1 }
 0x1fa   :  { %542 = vsyncpa [#allocation4 + $0x1], 1 }
 0x1fb   :  { %543 = vsyncpa [#allocation6], 1 }

// kernel: batch_fn.3
= control target key start
LH: loop header
LB: loop body
LE: loop exit
PB: predicated region body
PF: predicated region fallthrough
CT: control target
= control target key end

     0   :  { %11 = vsyncpa [#allocation4], 0  ;;  %s1174_s0 = inlined_call_operand.vmem [shape: f32[3], index: 0, kind: input, shape index: {}]   ;;  %s1175_s1 = inlined_call_operand.vmem [shape: f32[3], index: 1, kind: input, shape index: {}]   ;;  %s1176_s2 = inlined_call_operand.vmem [shape: bf16[2,3,14,20], index: 2, kind: input, shape index: {}]   ;;  %s1177_s3 = inlined_call_operand.vmem [shape: bf16[32,14], index: 3, kind: input, shape index: {}]   ;;  %s1178_s4 = inlined_call_operand.vmem [shape: bf16[20,64], index: 4, kind: input, shape index: {}]   ;;  %s1179_s5 = inlined_call_operand.hbm [shape: f32[3,3,32,64], index: 5, kind: input, shape index: {}, may-alias: {5,6}]   ;;  %s1180_s6 = inlined_call_operand.hbm [shape: f32[3,3,32,64], index: 6, kind: output, shape index: {}, may-alias: {5,6}]  }
   0x1   :  { %12 = vsyncpa [#allocation6], 0 }
   0x2   :  { %13 = vsyncpa [#allocation3], 0 }
   0x3   :  { %15 = vsyncpa [#allocation3 + $0x1], 0  ;;  %s973_s21 = smov 0   ;;  %s975_s22 = smov 0  }
   0x4   :  { %s977_s23 = smov 0   ;;  %s979_s24 = smov 0  }
   0x5   :  { %s981_s25 = smov 0   ;;  %s983_s26 = smov 0  }
   0x6   :  { %s985_s5 = smov 0   ;;  %s987_s27 = smov 0  }
   0x7 LB: > { %s649_s28 = sadd.s32 4294967295, %s929_s27   ;;  %s650_s29 = sadd.s32 4294967294, %s929_s27   ;;  %s929_s27 = sphi %s987_s27, %s21_s27   ;;  %s925_s5 = sphi %s985_s5, %s1200_s5   ;;  %s921_s26 = sphi %s983_s26, %s1199_s26   ;;  %s917_s25 = sphi %s981_s25, %s1198_s25   ;;  %s913_s24 = sphi %s979_s24, %s1197_s24   ;;  %s909_s23 = sphi %s977_s23, %s1196_s23   ;;  %s905_s22 = sphi %s975_s22, %s1195_s22   ;;  %s901_s21 = sphi %s973_s21, %s1194_s21  }
   0x8   : > { %s36_s30 = sadd.s32 1, %s921_s26  ;;  %s40_s7 = sadd.s32 1, %s925_s5 }
   0x9   : > { %p38_p0 = scmp.ge.s32.totalorder %s36_s30, 3  ;;  %s170_s8 = sadd.s32 1, %s909_s23 }
   0xa   : > { %p180_p1 = scmp.ne.s32.totalorder %s909_s23, %s905_s22  ;;  %p181_p2 = scmp.eq.s32.totalorder %s649_s28, 5 }
   0xb   : > { %s1202_s30 = smov (%p38_p0, %s36_s30), 0  ;;  %p186_p5 = scmp.ne.s32.totalorder %s905_s22, %s901_s21 }
   0xc   : > { %s41_s9 = scalar_select %p38_p0, %s40_s7, %s925_s5 }
   0xd   : > { %s164_s10 = ssub.s32 %s921_s26, %s1202_s30  ;;  %p1025_p3 = por %p181_p2, %p180_p1 }
   0xe   : > { %p42_p4 = scmp.ge.s32.totalorder %s41_s9, 2  ;;  %p187_p6 = scmp.eq.s32.totalorder %s650_s29, 5 }
   0xf   : > { %s1185_s11 = scalar_select %p1025_p3, 1, 0 }
  0x10   : > { %p651_p7 = scmp.ge.s32.totalorder %s929_s27, 1  ;;  %s1204_s9 = smov (%p42_p4, %s41_s9), 0 }
  0x11   : > { %p1034_p8 = por %p187_p6, %p186_p5  ;;  %p194_p9 = scmp.lt.s32.totalorder %s929_s27, 7 }
  0x12   : > { %s162_s13 = sadd.s32 1, %s1204_s9  ;;  %p1044_p11 = scmp.eq.s32.totalorder %s649_s28, 0 }
  0x13   : > { %s1186_s12 = scalar_select %p1034_p8, 1, 0 }
  0x14   : > { %s163_s14 = ssub.s32 %s40_s7, %s162_s13  ;;  %p1040_p10 = pnand %p651_p7, %p194_p9 }
  0x15   : > { %s165_s16 = sor.u32 %s164_s10, %s163_s14  ;;  %s207_s20 = sshll.u32 %s1174_s0, 4  ;;  %s208_s20 = int_to_ptr.vmem [resolvable:$true] %s207_s20 }
  0x16   : > { %s1187_s15 = scalar_select %p1040_p10, 1, 0 }
  0x17   : > { %s1188_s17 = scalar_select %p1044_p11, 1, 0 }
  0x18   : > { %p168_p12 = scmp.eq.s32.totalorder %s165_s16, 0  ;;  %p707_p13 = pneg %p1040_p10 }
  0x19   : > { %s218_s13 = sshll.u32 %s1175_s1, 4  ;;  %s798_s14 = scalar_lea.vmem %s208_s20, 16  ;;  %s219_s13 = int_to_ptr.vmem [resolvable:$true] %s218_s13 }
  0x1a   : > { %s1054_s29 = scalar_select %p168_p12, %s909_s23, %s170_s8  }
  0x1b   : > { %p1058_p0 = pnand %p1044_p11, %p707_p13  ;;  %p799_p1 = scmp.ne.s32.totalorder %s208_s20, %s798_s14 }
  0x1c   : > { %p806_p6 = scmp.lt.s32.totalorder %s208_s20, %s208_s20  ;;  %p807_p7 = scmp.lt.s32.totalorder %s798_s14, %s798_s14 }
  0x1d   : > { %p800_p2 = pneg %p1058_p0 }
  0x1e   : > { %p808_p9 = por %p807_p7, %p806_p6 }
  0x1f   : > { %p801_p4 = pnand %p800_p2, %p799_p1 }
  0x21   : > { %p802_p5 = pneg %p801_p4 }
  0x23   : > { %p809_p12 = pnand %p808_p9, %p802_p5 }
  0x25   : > { %812 = shalt.err (!%p809_p12)
}
  0x26   : > { %s931_s8 = smov [#allocation2]   ;;  %s813_s16 = scalar_lea.vmem %s219_s13, 16 }
  0x27   : > { %710 = dma.vmem_to_smem (!%p1058_p0), %s208_s20, 16, %s931_s8, [#allocation4]  }
  0x28   : > { %p814_p13 = scmp.ne.s32.totalorder %s219_s13, %s813_s16  ;;  %p821_p11 = scmp.lt.s32.totalorder %s219_s13, %s219_s13 }
  0x29   : > { %p822_p10 = scmp.lt.s32.totalorder %s813_s16, %s813_s16 }
  0x2a   : > { %p816_p8 = pnand %p814_p13, %p800_p2 }
  0x2b   : > { %p823_p1 = por %p822_p10, %p821_p11 }
  0x2c   : > { %p817_p3 = pneg %p816_p8 }
  0x2e   : > { %p824_p4 = pnand %p823_p1, %p817_p3 }
  0x30   : > { %827 = shalt.err (!%p824_p4)
}
  0x31   : > { %s932_s18 = smov [#allocation5]   ;;  %p1190_p5 = scmp.ne.s32.totalorder %s1187_s15, 0 }
  0x32   : > { %713 = dma.vmem_to_smem (!%p1058_p0), %s219_s13, 16, %s932_s18, [#allocation6]  }
  0x33   : > { %255 = sbr.rel (%p1190_p5) target bundleno = 492 (0x1ec), region = 40  ;;  %p1191_p6 = scmp.ne.s32.totalorder (!%p1190_p5), %s1188_s17, 0 }
  0x38   : > { %888 = dma.done.wait (%p1191_p6), [#allocation4], 16  }
  0x39   : > { %890 = vsyncadd (%p1191_p6), [#allocation4], 4294967280 }
  0x3a   : > { %892 = dma.done.wait (%p1191_p6), [#allocation6], 16  }
  0x3b   : > { %894 = vsyncadd (%p1191_p6), [#allocation6], 4294967280 }
  0x3c   : > { %265 = sfence }
  0x3d   : > { %v793_v0 = vld [vmem:[%s1178_s4 + $0x8] ss:$0 sps:$4 sm:$0x33]   ;;  %v933_v1 = vmov 0.0   ;;  %vm338_vm0 = vcmask 1041408   ;;  %v794_v3 = vld [vmem:[%s1178_s4] sm:$0xff]   ;;  %v472_v13 = vlaneseq }
  0x3e   : > { %681 = vmatprep.subr.bf16.mxu0 %v933_v1  ;;  %v340_v2 = vsel %vm338_vm0, %v793_v0, 0  ;;  %p297_p3 = scmp.lt.s32.totalorder %s917_s25, 1  ;;  %p299_p8 = scmp.lt.s32.totalorder %s913_s24, 2  ;;  %vm934_vm1 = vmmov 0   ;;  %vm334_vm2 = vcmask 162816   ;;  %v796_v5 = vld [vmem:[%s1177_s3] sm:$0xff]  }
  0x3f   : > { %682 = vmatpush3.bf16.msra.mxu0 %v340_v2  ;;  %685 = vmatprep.mubr.msk.bf16.mxu0 %vm934_vm1, %v933_v1  ;;  %vm398_vm3 = vcmask 113664   ;;  %vm405_vm4 = vcmask 1046528   ;;  %v797_v12 = vld [vmem:[%s1177_s3 + $0x8] sm:$0xff]   ;;  %v473_v14 = vand.u32 127, %v472_v13  ;;  %s671_s16 = sshll.u32 %s913_s24, 2  ;;  %vm497_vm6 = vcmask 523264  }
  0x40   : > { %683 = vmatprep.subr.bf16.mxu0 %v933_v1  ;;  %s298_s17 = scalar_select %p297_p3, %s917_s25, 1  ;;  %691 = vmatprep.mubr.msk.bf16.mxu1 %vm398_vm3, %v796_v5 }
  0x41   : > { %s300_s28 = scalar_select %p299_p8, %s913_s24, 2  ;;  %vm478_vm5 = vcmp.lt.s32.totalorder %v473_v14, 34 }
  0x42   : > { %s696_s10 = smul.u32 6, %s298_s17  ;;  %p1192_p11 = scmp.ne.s32.totalorder %s1185_s11, 0 }
  0x43   : > { %684 = vmatpush3.bf16.msra.mxu0 %v794_v3  ;;  %s660_s13 = sshll.u32 %s300_s28, 1  ;;  %s458_s28 = sld [smem:[#allocation5 + %s913_s24]] }
  0x44   : > { %s303_s14 = sadd.s32 %s696_s10, %s660_s13  ;;  %s459_s10 = sld [smem:[#allocation2 + %s913_s24]] }
  0x45   : > { %s661_s8 = sshll.u32 %s303_s14, 2  ;;  %s579_s14 = smul.u32 12, %s917_s25 }
  0x46   : > { %s305_s19 = scalar_lea.vmem %s1176_s2, %s661_s8  ;;  %s294_s8 = sand.u32 1, %s905_s22  }
  0x47   : > { %v795_v4 = vld [vmem:[%s305_s19] sm:$0x7f]   ;;  %s659_s18 = sshll.u32 %s294_s8, 5  ;;  %s580_s19 = sadd.s32 %s671_s16, %s579_s14 }
  0x48   : > { %686 = vmatmul.mubr.msk.bf16.vlgmr.msra.gmra.mxu0 %vm334_vm2, %v795_v4  ;;  %s672_s20 = sshll.u32 %s580_s19, 7  ;;  %s296_s15 = scalar_lea.vmem [#allocation7], %s659_s18 }
  0x49   : > { %v483_v16 = vstv %s458_s28  ;;  %s521_s24 = sshll.u32 %s296_s15, 4  ;;  %s1111_s17 = scalar_lea.hbm %s1180_s6, %s672_s20  ;;  %s1118_s24 = int_to_ptr.vmem [resolvable:$true] %s521_s24 }
  0x4a   : > { %s460_s13 = smul.f32 %s459_s10, %s458_s28  ;;  %s1116_s28 = scalar_lea.hbm %s1111_s17, 1536 }
  0x4b   : > { %s1123_s10 = scalar_lea.sflag [#allocation3], %s294_s8  ;;  %s935_s14 = smov [#allocation7]  }
  0x4c   : > { %v488_v15 = vstv %s460_s13  ;;  %s828_s13 = scalar_lea.vmem %s1118_s24, 512  ;;  %s832_s16 = sshll.u32 %s935_s14, 4  ;;  %s833_s16 = int_to_ptr.vmem [resolvable:$false] %s832_s16 }
  0x4d   : > { %v489_v18 = vsel %vm478_vm5, %v488_v15, 0.0  ;;  %p829_p10 = scmp.ne.s32.totalorder %s1118_s24, %s828_s13  ;;  %s834_s18 = scalar_lea.vmem %s833_s16, 1024 }
  0x4e   : > { %p835_p7 = scmp.lt.s32.totalorder %s1118_s24, %s833_s16  ;;  %p836_p9 = scmp.lt.s32.totalorder %s834_s18, %s828_s13 }
  0x4f   : > { %p830_p0 = pnand %p829_p10, %p1192_p11 }
  0x50   : > { %p837_p12 = por %p836_p9, %p835_p7 }
  0x51   : > { %p831_p2 = pneg %p830_p0 }
  0x53   : > { %p838_p13 = pnand %p837_p12, %p831_p2 }
 0x108   : > { %v376_v6 = vpop.f32.mrf.mxu0 }
 0x10a   : > { %v687_v7 = vpop.f32.mrf.mxu0 }
 0x10c   : > { %v379_v8 = vpop.f32.mrf.mxu0 }
 0x10d   : > { %v387_v9 = vpack.c.bf16 %v379_v8, %v376_v6 }
 0x10e   : > { %v688_v10 = vpop.f32.mrf.mxu0 }
 0x10f   : > { %695 = vmatprep.subr.msk.bf16.mxu1 %vm405_vm4, %v387_v9  ;;  %v407_v11 = vsel %vm405_vm4, %v387_v9, 0 }
 0x110   : > { %690 = vmatpush3.bf16.msra.mxu1 %v407_v11 }
 0x113   : > { %692 = vmatmul.mubr.msk.bf16.vlgmr.msra.gmra.mxu1 %vm398_vm3, %v797_v12 }
 0x1d3   : > { %v693_v17 = vpop.f32.mrf.mxu1 }
 0x1d4   : > { %v486_v19 = vmul.f32 %v693_v17, %v483_v16 }
 0x1d5   : > { %v443_v20 = vpop.f32.mrf.mxu1 }
 0x1d6   : > { %v495_v21 = vsub.f32 %v486_v19, %v489_v18  ;;  %v484_v22 = vmul.f32 %v483_v16, %v443_v20 }
 0x1d7   : > { %v694_v23 = vpop.f32.mrf.mxu1 }
 0x1d8   : > { %500 = vst.msk [vmem:[%s296_s15 + $0x10] sm:$0xff] %vm497_vm6, %v495_v21  ;;  %v493_v24 = vsub.f32 %v484_v22, %v489_v18  ;;  %v487_v25 = vmul.f32 %v694_v23, %v483_v16 }
 0x1d9   : > { %v446_v26 = vpop.f32.mrf.mxu1 }
 0x1da   : > { %498 = vst.msk [vmem:[%s296_s15] sm:$0xff] %vm497_vm6, %v493_v24  ;;  %501 = vst.msk [vmem:[%s296_s15 + $0x18] sm:$0xff] %vm497_vm6, %v487_v25  ;;  %v485_v27 = vmul.f32 %v483_v16, %v446_v26 }
 0x1dc   : > { %v494_v28 = vsub.f32 %v485_v27, %v489_v18 }
 0x1de   : > { %499 = vst.msk [vmem:[%s296_s15 + $0x8] sm:$0xff] %vm497_vm6, %v494_v28 }
 0x1df   : > { %841 = shalt.err (!%p838_p13)
}
 0x1e0   : > { %s854_s8 = scalar_lea.hbm %s1111_s17, 2048  ;;  %s846_s15 = scalar_lea.hbm %s1180_s6, 4608 }
 0x1e1   : > { %p843_p1 = scmp.ne.s32.totalorder %s1116_s28, %s854_s8  ;;  %p847_p6 = scmp.lt.s32.totalorder %s1116_s28, %s1180_s6 }
 0x1e2   : > { %p848_p3 = scmp.lt.s32.totalorder %s846_s15, %s854_s8 }
 0x1e3   : > { %p844_p4 = pnand %p843_p1, %p1192_p11 }
 0x1e4   : > { %p849_p8 = por %p848_p3, %p847_p6 }
 0x1e5   : > { %p845_p5 = pneg %p844_p4 }
 0x1e7   : > { %p850_p10 = pnand %p849_p8, %p845_p5 }
 0x1e9   : > { %853 = shalt.err (!%p850_p10)
}
 0x1ea   : > { %s936_s13 = smov 128   ;;  %s937_s17 = smov 8  }
 0x1eb   : > { %705 = dma.vmem_to_hbm [thread:$0]  (%p1192_p11), %s1118_s24, 512, %s1116_s28, %s1123_s10, %s936_s13, %s936_s13, %s937_s17  }
 0x1ec PF: > { %p722_p0 = scmp.ge.s32.totalorder %s929_s27, 2  ;;  %s536_s14 = sand.u32 1, %s901_s21  }
 0x1ed   : > { %p1193_p2 = scmp.ne.s32.totalorder %s1186_s12, 0  ;;  %s537_s16 = scalar_lea.sflag [#allocation3], %s536_s14 }
 0x1ef   : > { %p715_p7 = pnand %p722_p0, %p1193_p2 }
 0x1f1   : > { %p716_p9 = pneg %p715_p7 }
 0x1f3   : > { %896 = dma.done.wait (%p716_p9), %s537_s16, 512  }
 0x1f4   : > { %898 = vsyncadd (%p716_p9), %s537_s16, 4294966784  ;;  %s21_s27 = sadd.s32 1, %s929_s27   ;;  %s1194_s21 = smov %s905_s22 }
 0x1f5   : > { %p18_p12 = scmp.ge.s32.totalorder %s21_s27, 8   ;;  %s1195_s22 = smov %s909_s23 }
 0x1f6   : > { %s1196_s23 = smov %s1054_s29  ;;  %s1197_s24 = smov %s921_s26 }
 0x1f7   : > { %s1198_s25 = smov %s925_s5  ;;  %s1199_s26 = smov %s1202_s30 }
 0x1f8   : > { %s1200_s5 = smov %s1204_s9  ;;  %20 = sbr.rel (!%p18_p12) target bundleno = 7 (0x7), region = 87 }
 0x1fd   :  { %542 = vsyncpa [#allocation3], 1 }
 0x1fe   :  { %544 = vsyncpa [#allocation3 + $0x1], 1 }
 0x1ff   :  { %545 = vsyncpa [#allocation4], 1 }
 0x200   :  { %547 = vsyncpa [#allocation4 + $0x1], 1 }
 0x201   :  { %548 = vsyncpa [#allocation6], 1 }

</bundles_post_ra>
